<compile_context>
chip_gen: v7x
topology: tpu7x:2x2x1
jax: 0.10.0
libtpu: 0.0.40
codegen_flags: <defaults>
</compile_context>

<pallas_src>
import functools

import jax
import jax.numpy as jnp
from jax import lax
from jax.experimental import pallas as pl
from jax.experimental.pallas import tpu as pltpu


def _elu(x):
    # PyTorch nn.ELU(alpha=1): x if x > 0 else exp(x) - 1
    return jnp.where(x > 0, x, jnp.exp(x) - 1.0)


def _tcn_block_kernel(x_ref, w_ref, scale_ref, shift_ref, o_ref, hp_ref, *,
                      kernel_size, dilations, T, pad_max):
    # x_ref:     (C, T)            one batch element
    # w_ref:     (L, C, K*C)       flattened conv weights, tap-major columns
    # scale_ref: (L, C, 1)         fused BatchNorm scale
    # shift_ref: (L, C, 1)         fused conv-bias + BatchNorm shift
    # o_ref:     (C, T)
    # hp_ref:    (C, pad_max + T)  VMEM scratch: [zeros | activation]
    C = x_ref.shape[0]
    K = kernel_size

    # Zero the scratch once; the left pad_max lanes stay zero for every layer.
    hp_ref[...] = jnp.zeros_like(hp_ref)

    h = x_ref[...].astype(jnp.float32)

    def conv_bn_elu(h, layer):
        d = dilations[layer]
        p = (K - 1) * d
        # Causal left pad inside VMEM (no extra HBM copy of the activation).
        hp_ref[:, pad_max:] = h
        base = pad_max - p
        # im2row: K causally shifted views stacked along sublanes -> (K*C, T),
        # so the conv is a single MXU dot with contraction K*C (=128).
        stacked = jnp.concatenate(
            [hp_ref[:, base + k * d: base + k * d + T] for k in range(K)],
            axis=0)
        y = jnp.dot(w_ref[layer], stacked, preferred_element_type=jnp.float32)
        y = y * scale_ref[layer] + shift_ref[layer]   # conv bias + BN (eval) fused
        return _elu(y)                                # Dropout = identity (eval)

    layer = 0
    for _sub in range(len(dilations) // 2):           # residual sub-blocks
        res = h
        h = conv_bn_elu(h, layer); layer += 1
        h = conv_bn_elu(h, layer); layer += 1
        h = _elu(h + res)                             # block += x ; ELU

    o_ref[...] = h.astype(o_ref.dtype)


def tcn_block_forward(x, w2d, scale, shift, *, kernel_size, dilations):
    """Fused TCN_block forward (eval mode).

    x:     (N, C, T)
    w2d:   (L, C, K*C)   flattened conv weights, L = 2 * depth
    scale: (L, C, 1)     gamma / sqrt(var + eps)
    shift: (L, C, 1)     scale * (conv_bias - running_mean) + beta
    """
    N, C, T = x.shape
    L, _, KC = w2d.shape
    K = kernel_size
    assert KC == K * C and L == len(dilations) and L % 2 == 0
    pad_max = (K - 1) * max(dilations)

    kernel = functools.partial(
        _tcn_block_kernel,
        kernel_size=K,
        dilations=tuple(int(d) for d in dilations),
        T=T,
        pad_max=pad_max,
    )

    return pl.pallas_call(
        kernel,
        out_shape=jax.ShapeDtypeStruct((N, C, T), x.dtype),
        grid_spec=pltpu.PrefetchScalarGridSpec(
            num_scalar_prefetch=0,
            grid=(N,),
            in_specs=[
                pl.BlockSpec((None, C, T), lambda n: (n, 0, 0)),       # x (per batch)
                pl.BlockSpec((L, C, K * C), lambda n: (0, 0, 0)),      # all conv weights
                pl.BlockSpec((L, C, 1), lambda n: (0, 0, 0)),          # fused BN scale
                pl.BlockSpec((L, C, 1), lambda n: (0, 0, 0)),          # fused bias+BN shift
            ],
            out_specs=pl.BlockSpec((None, C, T), lambda n: (n, 0, 0)),
            scratch_shapes=[pltpu.VMEM((C, T + pad_max), jnp.float32)],
        ),
        compiler_params=pltpu.CompilerParams(
            # Parallel batch axis so v7x's second TensorCore is used.
            dimension_semantics=("parallel",),
        ),
    )(x, w2d, scale, shift)


# ----------------------------- parameter glue --------------------------------

def init_tcn_block_params(key, *, channels=32, kernel_size=4, depth=2):
    """Per-layer params matching PyTorch TCN_block (eval-mode BatchNorm).

    Conv weight: kaiming_uniform_(nonlinearity='linear') -> U(-b, b), b = sqrt(3/fan_in)
    Conv bias:   PyTorch Conv1d default -> U(-1/sqrt(fan_in), 1/sqrt(fan_in))
    BN params randomized so the fused scale/shift path is actually exercised.
    """
    L = 2 * depth
    fan_in = channels * kernel_size
    w_bound = float(jnp.sqrt(3.0 / fan_in))
    b_bound = float(1.0 / jnp.sqrt(fan_in))
    keys = jax.random.split(key, L)
    params = []
    for l in range(L):
        kw, kb, kg, kbe, km, kv = jax.random.split(keys[l], 6)
        params.append(dict(
            weight=jax.random.uniform(kw, (channels, channels, kernel_size),
                                      minval=-w_bound, maxval=w_bound,
                                      dtype=jnp.float32),
            bias=jax.random.uniform(kb, (channels,), minval=-b_bound,
                                    maxval=b_bound, dtype=jnp.float32),
            gamma=jax.random.uniform(kg, (channels,), minval=0.5, maxval=1.5,
                                     dtype=jnp.float32),
            beta=jax.random.uniform(kbe, (channels,), minval=-0.5, maxval=0.5,
                                    dtype=jnp.float32),
            mean=0.1 * jax.random.normal(km, (channels,), dtype=jnp.float32),
            var=jax.random.uniform(kv, (channels,), minval=0.5, maxval=1.5,
                                   dtype=jnp.float32),
        ))
    return params


def pack_params(params, *, eps=1e-5):
    """Flatten conv weights tap-major and fold conv bias + BatchNorm."""
    w2d, scale, shift = [], [], []
    for p in params:
        c_out, c_in, k = p["weight"].shape
        # w2d[o, k*C_in + i] = weight[o, i, k]  (matches the sublane-stacked
        # shifted-input order built inside the kernel).
        w2d.append(jnp.transpose(p["weight"], (0, 2, 1)).reshape(c_out, k * c_in))
        s = p["gamma"] / jnp.sqrt(p["var"] + eps)
        scale.append(s.reshape(c_out, 1))
        shift.append((s * (p["bias"] - p["mean"]) + p["beta"]).reshape(c_out, 1))
    return jnp.stack(w2d), jnp.stack(scale), jnp.stack(shift)


# ------------------------------- reference -----------------------------------

def reference_tcn_block(x, params, *, kernel_size, depth, eps=1e-5):
    def causal_conv(h, w, b, d):
        pad = (w.shape[-1] - 1) * d
        y = lax.conv_general_dilated(
            jnp.pad(h, ((0, 0), (0, 0), (pad, 0))), w,
            window_strides=(1,), padding="VALID", rhs_dilation=(d,),
            dimension_numbers=("NCH", "OIH", "NCH"),
            precision=lax.Precision.HIGHEST)
        return y + b.reshape(1, -1, 1)

    def bn(h, p):
        s = (p["gamma"] / jnp.sqrt(p["var"] + eps)).reshape(1, -1, 1)
        return s * (h - p["mean"].reshape(1, -1, 1)) + p["beta"].reshape(1, -1, 1)

    h = x
    layer = 0
    for sub in range(depth):
        d = 2 ** sub
        res = h
        for _ in range(2):
            p = params[layer]
            h = _elu(bn(causal_conv(h, p["weight"], p["bias"], d), p))
            layer += 1
        h = _elu(h + res)
    return h


if __name__ == "__main__":
    # ATCNet's TCN input per sliding window: (batch, 32 channels, 16 time steps)
    N, C, T = 2, 32, 16
    K, DEPTH = 4, 2
    dilations = []
    for sub in range(DEPTH):
        dilations += [2 ** sub, 2 ** sub]       # [1, 1, 2, 2]

    key = jax.random.PRNGKey(0)
    k_x, k_p = jax.random.split(key)
    x = jax.random.normal(k_x, (N, C, T), dtype=jnp.float32)
    params = init_tcn_block_params(k_p, channels=C, kernel_size=K, depth=DEPTH)
    w2d, scale, shift = pack_params(params)

    y = tcn_block_forward(x, w2d, scale, shift,
                          kernel_size=K, dilations=dilations)
    y = jax.block_until_ready(y)

    y_ref = reference_tcn_block(x, params, kernel_size=K, depth=DEPTH)
    assert y.shape == (N, C, T), y.shape
    max_err = float(jnp.max(jnp.abs(y - y_ref)))
    assert jnp.allclose(y, y_ref, atol=1e-3, rtol=1e-3), max_err

    print("KERNEL_OK")
</pallas_src>

<mosaic_0001>
module attributes {stable_mosaic.version = 11 : i64} {
  func.func @_tcn_block_kernel(%arg0: i32, %arg1: memref<1x32x16xf32, #tpu.memory_space<vmem>>, %arg2: memref<4x32x128xf32, #tpu.memory_space<vmem>>, %arg3: memref<4x32x1xf32, #tpu.memory_space<vmem>>, %arg4: memref<4x32x1xf32, #tpu.memory_space<vmem>>, %arg5: memref<1x32x16xf32, #tpu.memory_space<vmem>>, %arg6: memref<32x22xf32, #tpu.memory_space<vmem>>) attributes {dimension_semantics = [#tpu.dimension_semantics<parallel>], iteration_bounds = array<i64: 2>, scalar_prefetch = 0 : i64, scratch_operands = 1 : i64, tpu.core_type = #tpu.core_type<tc>, window_params = [{transform_indices = @transform_0, window_bounds = array<i64: 1, 32, 16>}, {pipeline_mode = #tpu.pipeline_mode<synchronous>, transform_indices = @transform_1, window_bounds = array<i64: 4, 32, 128>}, {pipeline_mode = #tpu.pipeline_mode<synchronous>, transform_indices = @transform_2, window_bounds = array<i64: 4, 32, 1>}, {pipeline_mode = #tpu.pipeline_mode<synchronous>, transform_indices = @transform_3, window_bounds = array<i64: 4, 32, 1>}, {transform_indices = @transform_4, window_bounds = array<i64: 1, 32, 16>}]} {
    %cst = arith.constant 0.000000e+00 : f32
    %0 = vector.broadcast %cst : f32 to vector<32x22xf32>
    %c0 = arith.constant 0 : index
    %c0_0 = arith.constant 0 : index
    %1 = vector.load %arg6[%c0, %c0_0] : memref<32x22xf32, #tpu.memory_space<vmem>>, vector<32x22xf32>
    tpu.vector_store %arg6[%c0, %c0_0], %0 {strides = array<i32>} : memref<32x22xf32, #tpu.memory_space<vmem>>, vector<32x22xf32>,
    %c0_1 = arith.constant 0 : index
    %c0_2 = arith.constant 0 : index
    %c0_3 = arith.constant 0 : index
    %2 = vector.load %arg1[%c0_1, %c0_2, %c0_3] : memref<1x32x16xf32, #tpu.memory_space<vmem>>, vector<1x32x16xf32>
    %3 = vector.shape_cast %2 : vector<1x32x16xf32> to vector<32x16xf32>
    %c0_4 = arith.constant 0 : index
    %c6 = arith.constant 6 : index
    %4 = vector.load %arg6[%c0_4, %c6] : memref<32x22xf32, #tpu.memory_space<vmem>>, vector<32x16xf32>
    tpu.vector_store %arg6[%c0_4, %c6], %3 {strides = array<i32>} : memref<32x22xf32, #tpu.memory_space<vmem>>, vector<32x16xf32>,
    %c0_5 = arith.constant 0 : index
    %c3 = arith.constant 3 : index
    %5 = vector.load %arg6[%c0_5, %c3] : memref<32x22xf32, #tpu.memory_space<vmem>>, vector<32x16xf32>
    %c0_6 = arith.constant 0 : index
    %c4 = arith.constant 4 : index
    %6 = vector.load %arg6[%c0_6, %c4] : memref<32x22xf32, #tpu.memory_space<vmem>>, vector<32x16xf32>
    %c0_7 = arith.constant 0 : index
    %c5 = arith.constant 5 : index
    %7 = vector.load %arg6[%c0_7, %c5] : memref<32x22xf32, #tpu.memory_space<vmem>>, vector<32x16xf32>
    %c0_8 = arith.constant 0 : index
    %c6_9 = arith.constant 6 : index
    %8 = vector.load %arg6[%c0_8, %c6_9] : memref<32x22xf32, #tpu.memory_space<vmem>>, vector<32x16xf32>
    %9 = tpu.concatenate %5, %6, %7, %8 in 0 : vector<32x16xf32>, vector<32x16xf32>, vector<32x16xf32>, vector<32x16xf32> -> vector<128x16xf32>
    %c0_10 = arith.constant 0 : index
    %c0_11 = arith.constant 0 : index
    %c0_12 = arith.constant 0 : index
    %10 = vector.load %arg2[%c0_10, %c0_11, %c0_12] : memref<4x32x128xf32, #tpu.memory_space<vmem>>, vector<1x32x128xf32>
    %11 = vector.shape_cast %10 : vector<1x32x128xf32> to vector<32x128xf32>
    %cst_13 = arith.constant dense<0.000000e+00> : vector<32x16xf32>
    %12 = tpu.matmul %11, %9, %cst_13 {dimension_numbers = #tpu.dot_dimension_numbers<[1], [0], [0], [1], [0, 0, 1, 1], [], []>} : vector<32x128xf32>, vector<128x16xf32>, vector<32x16xf32> -> vector<32x16xf32>
    %c0_14 = arith.constant 0 : index
    %c0_15 = arith.constant 0 : index
    %c0_16 = arith.constant 0 : index
    %13 = vector.load %arg3[%c0_14, %c0_15, %c0_16] : memref<4x32x1xf32, #tpu.memory_space<vmem>>, vector<1x32x1xf32>
    %14 = vector.shape_cast %13 : vector<1x32x1xf32> to vector<32x1xf32>
    %15 = vector.broadcast %14 : vector<32x1xf32> to vector<32x16xf32>
    %16 = arith.mulf %12, %15 : vector<32x16xf32>
    %c0_17 = arith.constant 0 : index
    %c0_18 = arith.constant 0 : index
    %c0_19 = arith.constant 0 : index
    %17 = vector.load %arg4[%c0_17, %c0_18, %c0_19] : memref<4x32x1xf32, #tpu.memory_space<vmem>>, vector<1x32x1xf32>
    %18 = vector.shape_cast %17 : vector<1x32x1xf32> to vector<32x1xf32>
    %19 = vector.broadcast %18 : vector<32x1xf32> to vector<32x16xf32>
    %20 = arith.addf %16, %19 : vector<32x16xf32>
    %cst_20 = arith.constant 0.000000e+00 : f32
    %21 = vector.broadcast %cst_20 : f32 to vector<32x16xf32>
    %22 = arith.cmpf ogt, %20, %21 : vector<32x16xf32>
    %23 = math.exp %20 : vector<32x16xf32>
    %cst_21 = arith.constant 1.000000e+00 : f32
    %24 = vector.broadcast %cst_21 : f32 to vector<32x16xf32>
    %25 = arith.subf %23, %24 : vector<32x16xf32>
    %26 = arith.select %22, %20, %25 : vector<32x16xi1>, vector<32x16xf32>
    %c0_22 = arith.constant 0 : index
    %c6_23 = arith.constant 6 : index
    %27 = vector.load %arg6[%c0_22, %c6_23] : memref<32x22xf32, #tpu.memory_space<vmem>>, vector<32x16xf32>
    tpu.vector_store %arg6[%c0_22, %c6_23], %26 {strides = array<i32>} : memref<32x22xf32, #tpu.memory_space<vmem>>, vector<32x16xf32>,
    %c0_24 = arith.constant 0 : index
    %c3_25 = arith.constant 3 : index
    %28 = vector.load %arg6[%c0_24, %c3_25] : memref<32x22xf32, #tpu.memory_space<vmem>>, vector<32x16xf32>
    %c0_26 = arith.constant 0 : index
    %c4_27 = arith.constant 4 : index
    %29 = vector.load %arg6[%c0_26, %c4_27] : memref<32x22xf32, #tpu.memory_space<vmem>>, vector<32x16xf32>
    %c0_28 = arith.constant 0 : index
    %c5_29 = arith.constant 5 : index
    %30 = vector.load %arg6[%c0_28, %c5_29] : memref<32x22xf32, #tpu.memory_space<vmem>>, vector<32x16xf32>
    %c0_30 = arith.constant 0 : index
    %c6_31 = arith.constant 6 : index
    %31 = vector.load %arg6[%c0_30, %c6_31] : memref<32x22xf32, #tpu.memory_space<vmem>>, vector<32x16xf32>
    %32 = tpu.concatenate %28, %29, %30, %31 in 0 : vector<32x16xf32>, vector<32x16xf32>, vector<32x16xf32>, vector<32x16xf32> -> vector<128x16xf32>
    %c1 = arith.constant 1 : index
    %c0_32 = arith.constant 0 : index
    %c0_33 = arith.constant 0 : index
    %33 = vector.load %arg2[%c1, %c0_32, %c0_33] : memref<4x32x128xf32, #tpu.memory_space<vmem>>, vector<1x32x128xf32>
    %34 = vector.shape_cast %33 : vector<1x32x128xf32> to vector<32x128xf32>
    %cst_34 = arith.constant dense<0.000000e+00> : vector<32x16xf32>
    %35 = tpu.matmul %34, %32, %cst_34 {dimension_numbers = #tpu.dot_dimension_numbers<[1], [0], [0], [1], [0, 0, 1, 1], [], []>} : vector<32x128xf32>, vector<128x16xf32>, vector<32x16xf32> -> vector<32x16xf32>
    %c1_35 = arith.constant 1 : index
    %c0_36 = arith.constant 0 : index
    %c0_37 = arith.constant 0 : index
    %36 = vector.load %arg3[%c1_35, %c0_36, %c0_37] : memref<4x32x1xf32, #tpu.memory_space<vmem>>, vector<1x32x1xf32>
    %37 = vector.shape_cast %36 : vector<1x32x1xf32> to vector<32x1xf32>
    %38 = vector.broadcast %37 : vector<32x1xf32> to vector<32x16xf32>
    %39 = arith.mulf %35, %38 : vector<32x16xf32>
    %c1_38 = arith.constant 1 : index
    %c0_39 = arith.constant 0 : index
    %c0_40 = arith.constant 0 : index
    %40 = vector.load %arg4[%c1_38, %c0_39, %c0_40] : memref<4x32x1xf32, #tpu.memory_space<vmem>>, vector<1x32x1xf32>
    %41 = vector.shape_cast %40 : vector<1x32x1xf32> to vector<32x1xf32>
    %42 = vector.broadcast %41 : vector<32x1xf32> to vector<32x16xf32>
    %43 = arith.addf %39, %42 : vector<32x16xf32>
    %cst_41 = arith.constant 0.000000e+00 : f32
    %44 = vector.broadcast %cst_41 : f32 to vector<32x16xf32>
    %45 = arith.cmpf ogt, %43, %44 : vector<32x16xf32>
    %46 = math.exp %43 : vector<32x16xf32>
    %cst_42 = arith.constant 1.000000e+00 : f32
    %47 = vector.broadcast %cst_42 : f32 to vector<32x16xf32>
    %48 = arith.subf %46, %47 : vector<32x16xf32>
    %49 = arith.select %45, %43, %48 : vector<32x16xi1>, vector<32x16xf32>
    %50 = arith.addf %49, %3 : vector<32x16xf32>
    %cst_43 = arith.constant 0.000000e+00 : f32
    %51 = vector.broadcast %cst_43 : f32 to vector<32x16xf32>
    %52 = arith.cmpf ogt, %50, %51 : vector<32x16xf32>
    %53 = math.exp %50 : vector<32x16xf32>
    %cst_44 = arith.constant 1.000000e+00 : f32
    %54 = vector.broadcast %cst_44 : f32 to vector<32x16xf32>
    %55 = arith.subf %53, %54 : vector<32x16xf32>
    %56 = arith.select %52, %50, %55 : vector<32x16xi1>, vector<32x16xf32>
    %c0_45 = arith.constant 0 : index
    %c6_46 = arith.constant 6 : index
    %57 = vector.load %arg6[%c0_45, %c6_46] : memref<32x22xf32, #tpu.memory_space<vmem>>, vector<32x16xf32>
    tpu.vector_store %arg6[%c0_45, %c6_46], %56 {strides = array<i32>} : memref<32x22xf32, #tpu.memory_space<vmem>>, vector<32x16xf32>,
    %c0_47 = arith.constant 0 : index
    %c0_48 = arith.constant 0 : index
    %58 = vector.load %arg6[%c0_47, %c0_48] : memref<32x22xf32, #tpu.memory_space<vmem>>, vector<32x16xf32>
    %c0_49 = arith.constant 0 : index
    %c2 = arith.constant 2 : index
    %59 = vector.load %arg6[%c0_49, %c2] : memref<32x22xf32, #tpu.memory_space<vmem>>, vector<32x16xf32>
    %c0_50 = arith.constant 0 : index
    %c4_51 = arith.constant 4 : index
    %60 = vector.load %arg6[%c0_50, %c4_51] : memref<32x22xf32, #tpu.memory_space<vmem>>, vector<32x16xf32>
    %c0_52 = arith.constant 0 : index
    %c6_53 = arith.constant 6 : index
    %61 = vector.load %arg6[%c0_52, %c6_53] : memref<32x22xf32, #tpu.memory_space<vmem>>, vector<32x16xf32>
    %62 = tpu.concatenate %58, %59, %60, %61 in 0 : vector<32x16xf32>, vector<32x16xf32>, vector<32x16xf32>, vector<32x16xf32> -> vector<128x16xf32>
    %c2_54 = arith.constant 2 : index
    %c0_55 = arith.constant 0 : index
    %c0_56 = arith.constant 0 : index
    %63 = vector.load %arg2[%c2_54, %c0_55, %c0_56] : memref<4x32x128xf32, #tpu.memory_space<vmem>>, vector<1x32x128xf32>
    %64 = vector.shape_cast %63 : vector<1x32x128xf32> to vector<32x128xf32>
    %cst_57 = arith.constant dense<0.000000e+00> : vector<32x16xf32>
    %65 = tpu.matmul %64, %62, %cst_57 {dimension_numbers = #tpu.dot_dimension_numbers<[1], [0], [0], [1], [0, 0, 1, 1], [], []>} : vector<32x128xf32>, vector<128x16xf32>, vector<32x16xf32> -> vector<32x16xf32>
    %c2_58 = arith.constant 2 : index
    %c0_59 = arith.constant 0 : index
    %c0_60 = arith.constant 0 : index
    %66 = vector.load %arg3[%c2_58, %c0_59, %c0_60] : memref<4x32x1xf32, #tpu.memory_space<vmem>>, vector<1x32x1xf32>
    %67 = vector.shape_cast %66 : vector<1x32x1xf32> to vector<32x1xf32>
    %68 = vector.broadcast %67 : vector<32x1xf32> to vector<32x16xf32>
    %69 = arith.mulf %65, %68 : vector<32x16xf32>
    %c2_61 = arith.constant 2 : index
    %c0_62 = arith.constant 0 : index
    %c0_63 = arith.constant 0 : index
    %70 = vector.load %arg4[%c2_61, %c0_62, %c0_63] : memref<4x32x1xf32, #tpu.memory_space<vmem>>, vector<1x32x1xf32>
    %71 = vector.shape_cast %70 : vector<1x32x1xf32> to vector<32x1xf32>
    %72 = vector.broadcast %71 : vector<32x1xf32> to vector<32x16xf32>
    %73 = arith.addf %69, %72 : vector<32x16xf32>
    %cst_64 = arith.constant 0.000000e+00 : f32
    %74 = vector.broadcast %cst_64 : f32 to vector<32x16xf32>
    %75 = arith.cmpf ogt, %73, %74 : vector<32x16xf32>
    %76 = math.exp %73 : vector<32x16xf32>
    %cst_65 = arith.constant 1.000000e+00 : f32
    %77 = vector.broadcast %cst_65 : f32 to vector<32x16xf32>
    %78 = arith.subf %76, %77 : vector<32x16xf32>
    %79 = arith.select %75, %73, %78 : vector<32x16xi1>, vector<32x16xf32>
    %c0_66 = arith.constant 0 : index
    %c6_67 = arith.constant 6 : index
    %80 = vector.load %arg6[%c0_66, %c6_67] : memref<32x22xf32, #tpu.memory_space<vmem>>, vector<32x16xf32>
    tpu.vector_store %arg6[%c0_66, %c6_67], %79 {strides = array<i32>} : memref<32x22xf32, #tpu.memory_space<vmem>>, vector<32x16xf32>,
    %c0_68 = arith.constant 0 : index
    %c0_69 = arith.constant 0 : index
    %81 = vector.load %arg6[%c0_68, %c0_69] : memref<32x22xf32, #tpu.memory_space<vmem>>, vector<32x16xf32>
    %c0_70 = arith.constant 0 : index
    %c2_71 = arith.constant 2 : index
    %82 = vector.load %arg6[%c0_70, %c2_71] : memref<32x22xf32, #tpu.memory_space<vmem>>, vector<32x16xf32>
    %c0_72 = arith.constant 0 : index
    %c4_73 = arith.constant 4 : index
    %83 = vector.load %arg6[%c0_72, %c4_73] : memref<32x22xf32, #tpu.memory_space<vmem>>, vector<32x16xf32>
    %c0_74 = arith.constant 0 : index
    %c6_75 = arith.constant 6 : index
    %84 = vector.load %arg6[%c0_74, %c6_75] : memref<32x22xf32, #tpu.memory_space<vmem>>, vector<32x16xf32>
    %85 = tpu.concatenate %81, %82, %83, %84 in 0 : vector<32x16xf32>, vector<32x16xf32>, vector<32x16xf32>, vector<32x16xf32> -> vector<128x16xf32>
    %c3_76 = arith.constant 3 : index
    %c0_77 = arith.constant 0 : index
    %c0_78 = arith.constant 0 : index
    %86 = vector.load %arg2[%c3_76, %c0_77, %c0_78] : memref<4x32x128xf32, #tpu.memory_space<vmem>>, vector<1x32x128xf32>
    %87 = vector.shape_cast %86 : vector<1x32x128xf32> to vector<32x128xf32>
    %cst_79 = arith.constant dense<0.000000e+00> : vector<32x16xf32>
    %88 = tpu.matmul %87, %85, %cst_79 {dimension_numbers = #tpu.dot_dimension_numbers<[1], [0], [0], [1], [0, 0, 1, 1], [], []>} : vector<32x128xf32>, vector<128x16xf32>, vector<32x16xf32> -> vector<32x16xf32>
    %c3_80 = arith.constant 3 : index
    %c0_81 = arith.constant 0 : index
    %c0_82 = arith.constant 0 : index
    %89 = vector.load %arg3[%c3_80, %c0_81, %c0_82] : memref<4x32x1xf32, #tpu.memory_space<vmem>>, vector<1x32x1xf32>
    %90 = vector.shape_cast %89 : vector<1x32x1xf32> to vector<32x1xf32>
    %91 = vector.broadcast %90 : vector<32x1xf32> to vector<32x16xf32>
    %92 = arith.mulf %88, %91 : vector<32x16xf32>
    %c3_83 = arith.constant 3 : index
    %c0_84 = arith.constant 0 : index
    %c0_85 = arith.constant 0 : index
    %93 = vector.load %arg4[%c3_83, %c0_84, %c0_85] : memref<4x32x1xf32, #tpu.memory_space<vmem>>, vector<1x32x1xf32>
    %94 = vector.shape_cast %93 : vector<1x32x1xf32> to vector<32x1xf32>
    %95 = vector.broadcast %94 : vector<32x1xf32> to vector<32x16xf32>
    %96 = arith.addf %92, %95 : vector<32x16xf32>
    %cst_86 = arith.constant 0.000000e+00 : f32
    %97 = vector.broadcast %cst_86 : f32 to vector<32x16xf32>
    %98 = arith.cmpf ogt, %96, %97 : vector<32x16xf32>
    %99 = math.exp %96 : vector<32x16xf32>
    %cst_87 = arith.constant 1.000000e+00 : f32
    %100 = vector.broadcast %cst_87 : f32 to vector<32x16xf32>
    %101 = arith.subf %99, %100 : vector<32x16xf32>
    %102 = arith.select %98, %96, %101 : vector<32x16xi1>, vector<32x16xf32>
    %103 = arith.addf %102, %56 : vector<32x16xf32>
    %cst_88 = arith.constant 0.000000e+00 : f32
    %104 = vector.broadcast %cst_88 : f32 to vector<32x16xf32>
    %105 = arith.cmpf ogt, %103, %104 : vector<32x16xf32>
    %106 = math.exp %103 : vector<32x16xf32>
    %cst_89 = arith.constant 1.000000e+00 : f32
    %107 = vector.broadcast %cst_89 : f32 to vector<32x16xf32>
    %108 = arith.subf %106, %107 : vector<32x16xf32>
    %109 = arith.select %105, %103, %108 : vector<32x16xi1>, vector<32x16xf32>
    %c0_90 = arith.constant 0 : index
    %c0_91 = arith.constant 0 : index
    %c0_92 = arith.constant 0 : index
    %110 = vector.load %arg5[%c0_90, %c0_91, %c0_92] : memref<1x32x16xf32, #tpu.memory_space<vmem>>, vector<1x32x16xf32>
    %111 = vector.shape_cast %110 : vector<1x32x16xf32> to vector<32x16xf32>
    %112 = vector.shape_cast %109 : vector<32x16xf32> to vector<1x32x16xf32>
    tpu.vector_store %arg5[%c0_90, %c0_91, %c0_92], %112 {strides = array<i32>} : memref<1x32x16xf32, #tpu.memory_space<vmem>>, vector<1x32x16xf32>,
    return
  }
  func.func @transform_0(%arg0: i32) -> (i32, i32, i32) {
    %c0_i32 = arith.constant 0 : i32
    %c0_i32_0 = arith.constant 0 : i32
    %c0_i32_1 = arith.constant 0 : i32
    return %arg0, %c0_i32, %c0_i32_0 : i32, i32, i32
  }
  func.func @transform_1(%arg0: i32) -> (i32, i32, i32) {
    %c0_i32 = arith.constant 0 : i32
    %c0_i32_0 = arith.constant 0 : i32
    %c0_i32_1 = arith.constant 0 : i32
    %c0_i32_2 = arith.constant 0 : i32
    return %c0_i32, %c0_i32_0, %c0_i32_1 : i32, i32, i32
  }
  func.func @transform_2(%arg0: i32) -> (i32, i32, i32) {
    %c0_i32 = arith.constant 0 : i32
    %c0_i32_0 = arith.constant 0 : i32
    %c0_i32_1 = arith.constant 0 : i32
    %c0_i32_2 = arith.constant 0 : i32
    return %c0_i32, %c0_i32_0, %c0_i32_1 : i32, i32, i32
  }
  func.func @transform_3(%arg0: i32) -> (i32, i32, i32) {
    %c0_i32 = arith.constant 0 : i32
    %c0_i32_0 = arith.constant 0 : i32
    %c0_i32_1 = arith.constant 0 : i32
    %c0_i32_2 = arith.constant 0 : i32
    return %c0_i32, %c0_i32_0, %c0_i32_1 : i32, i32, i32
  }
  func.func @transform_4(%arg0: i32) -> (i32, i32, i32) {
    %c0_i32 = arith.constant 0 : i32
    %c0_i32_0 = arith.constant 0 : i32
    %c0_i32_1 = arith.constant 0 : i32
    return %arg0, %c0_i32, %c0_i32_0 : i32, i32, i32
  }
}

</mosaic_0001>

<bundles_post_ra>
// kernel: tpu_custom_call.1
= control target key start
LH: loop header
LB: loop body
LE: loop exit
PB: predicated region body
PF: predicated region fallthrough
CT: control target
= control target key end

     0   :  { %s2017_s15 = smov 0   ;;  %s2289_s0 = inlined_call_operand.vmem [shape: f32[2,32,16], index: 0, kind: input, shape index: {}]   ;;  %s2290_s1 = inlined_call_operand.vmem [shape: f32[4,32,128], index: 1, kind: input, shape index: {}]   ;;  %s2291_s2 = inlined_call_operand.vmem [shape: f32[4,32,1], index: 2, kind: input, shape index: {}]   ;;  %s2292_s3 = inlined_call_operand.vmem [shape: f32[4,32,1], index: 3, kind: input, shape index: {}]   ;;  %s2293_s4 = inlined_call_operand.vmem [shape: f32[2,32,16], index: 4, kind: output, shape index: {}]  }
   0x1 LB: > { %s1297_s16 = sadd.s32 4294967295, %s1982_s15   ;;  %p1301_p0 = scmp.ge.s32.totalorder %s1982_s15, 1  ;;  %s1982_s15 = sphi %s2017_s15, %s14_s15  }
   0x2   : > { %p162_p1 = scmp.lt.s32.totalorder %s1982_s15, 3 }
   0x4   : > { %p163_p2 = pnand %p1301_p0, %p162_p1 }
   0x5   : > { %p188_p3 = scmp.lt.s32.totalorder (!%p163_p2), %s1297_s16, 1  ;;  %vm198_vm0 = vcmask (!%p163_p2), 179200   ;;  %v1984_v0 = vmov (!%p163_p2), 0.0   ;;  %s1985_s21 = smov (!%p163_p2), 6   ;;  %vm223_vm1 = vcmask (!%p163_p2), 179248   ;;  %v260_v27 = vld [vmem:[%s2290_s1] sm:$0xff] (!%p163_p2) }
   0x6   : > { %166 = sbr.rel (%p163_p2) target bundleno = 2296 (0x8f8), region = 36  ;;  %201 = vst.msk [vmem:[#allocation2 + $0x10] sm:$0xff] (!%p163_p2), %vm198_vm0, %v1984_v0  ;;  %199 = vst.msk [vmem:[#allocation2] sm:$0xff] (!%p163_p2), %vm198_vm0, %v1984_v0  ;;  %s1986_s22 = smov (!%p163_p2), 127   ;;  %1482 = vmatprep.mubr.f32.mxu0 (!%p163_p2), %v260_v27  ;;  %v390_v28 = vld [vmem:[%s2291_s2 + $0x8] sm:$0xff] (!%p163_p2)  ;;  %v389_v29 = vld [vmem:[%s2291_s2] sm:$0xff] (!%p163_p2) }
   0x7   : > { %200 = vst.msk [vmem:[#allocation2 + $0x8] sm:$0xff] (!%p163_p2), %vm198_vm0, %v1984_v0  ;;  %202 = vst.msk [vmem:[#allocation2 + $0x18] sm:$0xff] (!%p163_p2), %vm198_vm0, %v1984_v0  ;;  %s1987_s23 = smov (!%p163_p2), 126   ;;  %s1988_s24 = smov (!%p163_p2), 125   ;;  %v1989_v30 = vmov (!%p163_p2), 0   ;;  %v417_v31 = vld [vmem:[%s2292_s3] sm:$0xff] (!%p163_p2) }
   0x8   : > { %1807 = vset.pattern.permute.xlu1 (!%p163_p2), %v1989_v30  ;;  %1806 = vset.pattern.permute.xlu0 (!%p163_p2), %v1989_v30  ;;  %v418_v32 = vld [vmem:[%s2292_s3 + $0x8] sm:$0xff] (!%p163_p2)  ;;  %v391_v33 = vld [vmem:[%s2291_s2 + $0x10] sm:$0xff] (!%p163_p2)  ;;  %v392_v34 = vld [vmem:[%s2291_s2 + $0x18] sm:$0xff] (!%p163_p2)  ;;  %s1990_s6 = smov (!%p163_p2), 124   ;;  %s1991_s7 = smov (!%p163_p2), 122  }
   0x9   : > { %v419_v35 = vld [vmem:[%s2292_s3 + $0x10] sm:$0xff] (!%p163_p2)  ;;  %v420_v36 = vld [vmem:[%s2292_s3 + $0x18] sm:$0xff] (!%p163_p2)  ;;  %v261_v61 = vld [vmem:[%s2290_s1 + $0x8] sm:$0xff] (!%p163_p2) }
   0xa   : > { %v262_v62 = vld [vmem:[%s2290_s1 + $0x10] sm:$0xff] (!%p163_p2)  ;;  %v263_v63 = vld [vmem:[%s2290_s1 + $0x18] sm:$0xff] (!%p163_p2) }
   0xd   : > { %s2295_s16 = smov (!%p188_p3, %s1297_s16), 1 }
   0xe   : > { %s1368_s17 = sshll.u32 %s2295_s16, 5 }
   0xf   : > { %s192_s20 = scalar_lea.vmem %s2289_s0, %s1368_s17  ;;  %s197_s14 = scalar_lea.vmem %s2293_s4, %s1368_s17 }
  0x10   : > { %v2033_v1 = vld [vmem:[%s192_s20 + $0x10] sm:$0xff]  ;;  %v2035_v2 = vld [vmem:[%s192_s20] sm:$0xff]  ;;  %v2041_v3 = vld [vmem:[%s192_s20 + $0x18] sm:$0xff] }
  0x11   : > { %215 = vrot.lane.b32.xlu1 %v2033_v1, %s1985_s21  ;;  %211 = vrot.lane.b32.xlu0 %v2035_v2, %s1985_s21  ;;  %v2043_v4 = vld [vmem:[%s192_s20 + $0x8] sm:$0xff] }
  0x15   : > { %217 = vrot.lane.b32.xlu1 %v2041_v3, %s1985_s21  ;;  %213 = vrot.lane.b32.xlu0 %v2043_v4, %s1985_s21 }
  0x83   : > { %v216_v5 = vpop.permute.xlu1 %215  ;;  %v212_v6 = vpop.permute.xlu0 %211 }
  0x84   : > { %226 = vst.msk [vmem:[#allocation2 + $0x10] sm:$0xff] %vm223_vm1, %v216_v5  ;;  %224 = vst.msk [vmem:[#allocation2] sm:$0xff] %vm223_vm1, %v212_v6 }
  0x87   : > { %v218_v7 = vpop.permute.xlu1 %217  ;;  %v214_v8 = vpop.permute.xlu0 %213 }
  0x88   : > { %227 = vst.msk [vmem:[#allocation2 + $0x18] sm:$0xff] %vm223_vm1, %v218_v7  ;;  %225 = vst.msk [vmem:[#allocation2 + $0x8] sm:$0xff] %vm223_vm1, %v214_v8 }
  0x8b   : > { %v230_v9 = vld [vmem:[#allocation2 + $0x10] sm:$0xff]  ;;  %v228_v11 = vld [vmem:[#allocation2] sm:$0xff] }
  0x8f   : > { %v231_v10 = vld [vmem:[#allocation2 + $0x18] sm:$0xff]  ;;  %v229_v12 = vld [vmem:[#allocation2 + $0x8] sm:$0xff] }
  0x90   : > { %v1751_v13 = vpack.i.bf16 %v231_v10, %v230_v9  ;;  %v1746_v14 = vpack.i.bf16 %v229_v12, %v228_v11 }
  0x92   : > { %1752 = vrot.lane.b32.xlu1 %v1751_v13, %s1986_s22  ;;  %1747 = vrot.lane.b32.xlu0 %v1746_v14, %s1986_s22 }
  0x96   : > { %1762 = vrot.lane.b32.xlu1 %v1751_v13, %s1987_s23  ;;  %1757 = vrot.lane.b32.xlu0 %v1746_v14, %s1987_s23 }
  0x9a   : > { %1772 = vrot.lane.b32.xlu1 %v1751_v13, %s1988_s24  ;;  %1767 = vrot.lane.b32.xlu0 %v1746_v14, %s1988_s24 }
 0x104   : > { %v1753_v15 = vpop.permute.xlu1 %1752  ;;  %v1748_v16 = vpop.permute.xlu0 %1747 }
 0x105   : > { %1782 = vrot.lane.b32.xlu1 %v1753_v15, %s1988_s24  ;;  %1777 = vrot.lane.b32.xlu0 %v1748_v16, %s1988_s24 }
 0x108   : > { %v1763_v17 = vpop.permute.xlu1 %1762  ;;  %v1758_v18 = vpop.permute.xlu0 %1757 }
 0x109   : > { %1792 = vrot.lane.b32.xlu1 %v1763_v17, %s1988_s24  ;;  %1787 = vrot.lane.b32.xlu0 %v1758_v18, %s1988_s24 }
 0x10c   : > { %v1773_v19 = vpop.permute.xlu1 %1772  ;;  %v1768_v20 = vpop.permute.xlu0 %1767 }
 0x10d   : > { %v1775_v21 = vunpack.i.h.bf16 %v1773_v19  ;;  %v1774_v22 = vunpack.i.l.bf16 %v1773_v19  ;;  %v1770_v23 = vunpack.i.h.bf16 %v1768_v20  ;;  %v1769_v24 = vunpack.i.l.bf16 %v1768_v20  ;;  %1802 = vrot.lane.b32.xlu1 %v1773_v19, %s1988_s24  ;;  %1797 = vrot.lane.b32.xlu0 %v1768_v20, %s1988_s24 }
 0x10f   : > { %v1602_v25 = vpack.c.bf16 %v1770_v23, %v1769_v24  ;;  %v1606_v26 = vpack.c.bf16 %v1775_v21, %v1774_v22 }
 0x111   : > { %1603 = vmatprep.subr.bf16.mxu0 %v1602_v25  ;;  %400 = vperm.xlu1 %1807, %v390_v28  }
 0x112   : > { %1605 = vmatpush3.bf16.msra.mxu0 %v1602_v25  ;;  %395 = vperm.xlu0 %1806, %v389_v29  }
 0x113   : > { %1607 = vmatprep.subr.bf16.mxu0 %v1606_v26 }
 0x115   : > { %423 = vperm.xlu1 %1807, %v417_v31  }
 0x116   : > { %1609 = vmatpush3.bf16.msra.mxu0 %v1606_v26  ;;  %428 = vperm.xlu0 %1806, %v418_v32  }
 0x119   : > { %405 = vperm.xlu1 %1807, %v391_v33  }
 0x11a   : > { %410 = vperm.xlu0 %1806, %v392_v34  }
 0x11d   : > { %433 = vperm.xlu1 %1807, %v419_v35  }
 0x11e   : > { %438 = vperm.xlu0 %1806, %v420_v36  }
 0x177   : > { %v1783_v37 = vpop.permute.xlu1 %1782  ;;  %v1778_v38 = vpop.permute.xlu0 %1777 }
 0x178   : > { %v1785_v39 = vunpack.i.h.bf16 %v1783_v37  ;;  %v1784_v40 = vunpack.i.l.bf16 %v1783_v37  ;;  %v1780_v41 = vunpack.i.h.bf16 %v1778_v38  ;;  %v1779_v42 = vunpack.i.l.bf16 %v1778_v38 }
 0x17a   : > { %v1610_v43 = vpack.c.bf16 %v1780_v41, %v1779_v42  ;;  %v1614_v45 = vpack.c.bf16 %v1785_v39, %v1784_v40 }
 0x17b   : > { %v1788_v44 = vpop.permute.xlu0 %1787  ;;  %v1793_v48 = vpop.permute.xlu1 %1792 }
 0x17c   : > { %v1790_v46 = vunpack.i.h.bf16 %v1788_v44  ;;  %v1789_v47 = vunpack.i.l.bf16 %v1788_v44  ;;  %1611 = vmatprep.subr.bf16.mxu0 %v1610_v43  ;;  %v1795_v49 = vunpack.i.h.bf16 %v1793_v48  ;;  %v1794_v50 = vunpack.i.l.bf16 %v1793_v48 }
 0x17d   : > { %1613 = vmatpush3.bf16.msra.mxu0 %v1610_v43 }
 0x17e   : > { %1615 = vmatprep.subr.bf16.mxu0 %v1614_v45  ;;  %v1618_v51 = vpack.c.bf16 %v1790_v46, %v1789_v47  ;;  %v1622_v53 = vpack.c.bf16 %v1795_v49, %v1794_v50 }
 0x17f   : > { %v1798_v52 = vpop.permute.xlu0 %1797  ;;  %v1803_v56 = vpop.permute.xlu1 %1802 }
 0x180   : > { %v1800_v54 = vunpack.i.h.bf16 %v1798_v52  ;;  %v1799_v55 = vunpack.i.l.bf16 %v1798_v52  ;;  %v1805_v57 = vunpack.i.h.bf16 %v1803_v56  ;;  %v1804_v58 = vunpack.i.l.bf16 %v1803_v56 }
 0x181   : > { %1617 = vmatpush3.bf16.msra.mxu0 %v1614_v45 }
 0x182   : > { %1619 = vmatprep.subr.bf16.mxu0 %v1618_v51  ;;  %v1626_v59 = vpack.c.bf16 %v1800_v54, %v1799_v55  ;;  %v1630_v60 = vpack.c.bf16 %v1805_v57, %v1804_v58 }
 0x185   : > { %1621 = vmatpush3.bf16.msra.mxu0 %v1618_v51 }
 0x186   : > { %1623 = vmatprep.subr.bf16.mxu0 %v1622_v53 }
 0x189   : > { %1625 = vmatpush3.bf16.msra.mxu0 %v1622_v53 }
 0x18a   : > { %1627 = vmatprep.subr.bf16.mxu0 %v1626_v59 }
 0x18d   : > { %1629 = vmatpush3.bf16.msra.mxu0 %v1626_v59 }
 0x18e   : > { %1631 = vmatprep.subr.bf16.mxu0 %v1630_v60 }
 0x190   : > { %v401_v5 = vpop.permute.xlu1 %400 }
 0x191   : > { %1633 = vmatpush3.bf16.msra.mxu0 %v1630_v60  ;;  %v396_v0 = vpop.permute.xlu0 %395 }
 0x194   : > { %1483 = vmatmul.mubr.f32.vlgmr.msra.gmra.mrb[0].mxu0 %v261_v61  ;;  %v424_v7 = vpop.permute.xlu1 %423 }
 0x195   : > { %1485 = vmatprep.mubr.f32.mxu0 %v262_v62  ;;  %v429_v6 = vpop.permute.xlu0 %428  ;;  %v1314_v62 = vld [vmem:[%s2291_s2 + $0x20] sm:$0xff] }
 0x198   : > { %1486 = vmatmul.mubr.f32.gmra.mrb[2].mxu0 %v263_v63  ;;  %v406_v10 = vpop.permute.xlu1 %405  ;;  %v1310_v63 = vld [vmem:[%s2290_s1 + $0x20] sm:$0xff] }
 0x199   : > { %v411_v8 = vpop.permute.xlu0 %410  ;;  %1520 = vmatprep.mubr.f32.mxu1 %v1310_v63 }
 0x19c   : > { %v434_v23 = vpop.permute.xlu1 %433 }
 0x19d   : > { %v439_v20 = vpop.permute.xlu0 %438 }
 0x267   : > { %v1484_v9 = vpop.f32.mrb[0].mxu0 }
 0x268   : > { %v414_v11 = vmul.f32 %v1484_v9, %v401_v5  ;;  %v370_v12 = vpop.f32.mrb[1].mxu0  ;;  %v1318_v5 = vld [vmem:[%s2292_s3 + $0x20] sm:$0xff]  ;;  %v1320_v9 = vld [vmem:[%s2292_s3 + $0x30] sm:$0xff] }
 0x269   : > { %v413_v13 = vmul.f32 %v396_v0, %v370_v12  ;;  %v1315_v0 = vld [vmem:[%s2291_s2 + $0x28] sm:$0xff] }
 0x26a   : > { %v442_v14 = vadd.f32 %v429_v6, %v414_v11  ;;  %v1319_v6 = vld [vmem:[%s2292_s3 + $0x28] sm:$0xff] }
 0x26b   : > { %v441_v15 = vadd.f32 %v424_v7, %v413_v13  ;;  %v1487_v16 = vpop.f32.mrb[2].mxu0  ;;  %v1316_v7 = vld [vmem:[%s2291_s2 + $0x30] sm:$0xff] }
 0x26c   : > { %v451_v17 = vmul.f32 1.442695, %v442_v14  ;;  %v416_v18 = vmul.f32 %v1487_v16, %v411_v8  ;;  %v380_v19 = vpop.f32.mrb[3].mxu0  ;;  %vm446_vm2 = vcmp.gt.f32.partialorder %v442_v14, 0.0  ;;  %v1317_v8 = vld [vmem:[%s2291_s2 + $0x38] sm:$0xff] }
 0x26d   : > { %v449_v21 = vmul.f32 1.442695, %v441_v15  ;;  %v415_v22 = vmul.f32 %v406_v10, %v380_v19  ;;  %vm445_vm3 = vcmp.gt.f32.partialorder %v441_v15, 0.0  ;;  %v1321_v10 = vld [vmem:[%s2292_s3 + $0x38] sm:$0xff] }
 0x26e   : > { %1928 = vpow2.f32 %v451_v17  ;;  %v444_v24 = vadd.f32 %v439_v20, %v416_v18 }
 0x26f   : > { %1930 = vpow2.f32 %v449_v21  ;;  %v443_v25 = vadd.f32 %v434_v23, %v415_v22 }
 0x270   : > { %v455_v26 = vmul.f32 1.442695, %v444_v24  ;;  %vm448_vm4 = vcmp.gt.f32.partialorder %v444_v24, 0.0 }
 0x271   : > { %v453_v27 = vmul.f32 1.442695, %v443_v25  ;;  %vm447_vm5 = vcmp.gt.f32.partialorder %v443_v25, 0.0 }
 0x272   : > { %1932 = vpow2.f32 %v455_v26 }
 0x273   : > { %1934 = vpow2.f32 %v453_v27 }
 0x278   : > { %v1929_v28 = vpop.eup %1928 }
 0x279   : > { %v1931_v29 = vpop.eup %1930  ;;  %v1307_v30 = vadd.f32 -1.0, %v1929_v28 }
 0x27a   : > { %v1306_v31 = vadd.f32 -1.0, %v1931_v29 }
 0x27b   : > { %v462_v32 = vsel %vm446_vm2, %v442_v14, %v1307_v30 }
 0x27c   : > { %v1933_v33 = vpop.eup %1932  ;;  %471 = vrot.lane.b32.xlu0 %v462_v32, %s1985_s21  ;;  %v461_v34 = vsel %vm445_vm3, %v441_v15, %v1306_v31 }
 0x27d   : > { %v1935_v35 = vpop.eup %1934  ;;  %469 = vrot.lane.b32.xlu1 %v461_v34, %s1985_s21  ;;  %v1309_v36 = vadd.f32 -1.0, %v1933_v33 }
 0x27e   : > { %v1308_v37 = vadd.f32 -1.0, %v1935_v35  ;;  %v1311_v35 = vld [vmem:[%s2290_s1 + $0x28] sm:$0xff] }
 0x27f   : > { %v464_v38 = vsel %vm448_vm4, %v444_v24, %v1309_v36  ;;  %v1312_v36 = vld [vmem:[%s2290_s1 + $0x30] sm:$0xff] }
 0x280   : > { %475 = vrot.lane.b32.xlu0 %v464_v38, %s1985_s21  ;;  %v463_v39 = vsel %vm447_vm5, %v443_v25, %v1308_v37  ;;  %v1313_v37 = vld [vmem:[%s2290_s1 + $0x38] sm:$0xff] }
 0x281   : > { %473 = vrot.lane.b32.xlu1 %v463_v39, %s1985_s21 }
 0x2ee   : > { %v472_v40 = vpop.permute.xlu0 %471 }
 0x2ef   : > { %482 = vst.msk [vmem:[#allocation2 + $0x8] sm:$0xff] %vm223_vm1, %v472_v40  ;;  %v470_v41 = vpop.permute.xlu1 %469 }
 0x2f0   : > { %481 = vst.msk [vmem:[#allocation2] sm:$0xff] %vm223_vm1, %v470_v41 }
 0x2f2   : > { %v476_v42 = vpop.permute.xlu0 %475 }
 0x2f3   : > { %484 = vst.msk [vmem:[#allocation2 + $0x18] sm:$0xff] %vm223_vm1, %v476_v42  ;;  %v474_v43 = vpop.permute.xlu1 %473 }
 0x2f4   : > { %483 = vst.msk [vmem:[#allocation2 + $0x10] sm:$0xff] %vm223_vm1, %v474_v43 }
 0x2f6   : > { %v486_v44 = vld [vmem:[#allocation2 + $0x8] sm:$0xff] }
 0x2f7   : > { %v485_v45 = vld [vmem:[#allocation2] sm:$0xff] }
 0x2f8   : > { %v1808_v46 = vpack.i.bf16 %v486_v44, %v485_v45 }
 0x2fa   : > { %1809 = vrot.lane.b32.xlu1 %v1808_v46, %s1986_s22  ;;  %v488_v47 = vld [vmem:[#allocation2 + $0x18] sm:$0xff] }
 0x2fb   : > { %v487_v48 = vld [vmem:[#allocation2 + $0x10] sm:$0xff] }
 0x2fc   : > { %v1813_v49 = vpack.i.bf16 %v488_v47, %v487_v48 }
 0x2fe   : > { %1819 = vrot.lane.b32.xlu1 %v1808_v46, %s1987_s23  ;;  %1814 = vrot.lane.b32.xlu0 %v1813_v49, %s1986_s22 }
 0x302   : > { %1829 = vrot.lane.b32.xlu1 %v1808_v46, %s1988_s24  ;;  %1824 = vrot.lane.b32.xlu0 %v1813_v49, %s1987_s23 }
 0x306   : > { %1834 = vrot.lane.b32.xlu0 %v1813_v49, %s1988_s24 }
 0x36c   : > { %v1810_v50 = vpop.permute.xlu1 %1809 }
 0x36d   : > { %1839 = vrot.lane.b32.xlu1 %v1810_v50, %s1988_s24 }
 0x370   : > { %v1815_v51 = vpop.permute.xlu0 %1814  ;;  %v1820_v52 = vpop.permute.xlu1 %1819 }
 0x371   : > { %1844 = vrot.lane.b32.xlu0 %v1815_v51, %s1988_s24  ;;  %1849 = vrot.lane.b32.xlu1 %v1820_v52, %s1988_s24 }
 0x374   : > { %v1825_v53 = vpop.permute.xlu0 %1824  ;;  %v1830_v54 = vpop.permute.xlu1 %1829 }
 0x375   : > { %v1832_v55 = vunpack.i.h.bf16 %v1830_v54  ;;  %v1831_v56 = vunpack.i.l.bf16 %v1830_v54  ;;  %1854 = vrot.lane.b32.xlu0 %v1825_v53, %s1988_s24  ;;  %1859 = vrot.lane.b32.xlu1 %v1830_v54, %s1988_s24 }
 0x377   : > { %v1634_v57 = vpack.c.bf16 %v1832_v55, %v1831_v56 }
 0x378   : > { %v1835_v58 = vpop.permute.xlu0 %1834 }
 0x379   : > { %v1837_v59 = vunpack.i.h.bf16 %v1835_v58  ;;  %v1836_v60 = vunpack.i.l.bf16 %v1835_v58  ;;  %1635 = vmatprep.subr.bf16.mxu1 %v1634_v57  ;;  %1864 = vrot.lane.b32.xlu0 %v1835_v58, %s1988_s24 }
 0x37a   : > { %1637 = vmatpush3.bf16.msra.mxu1 %v1634_v57  ;;  %654 = vperm.xlu1 %1807, %v1314_v62  }
 0x37b   : > { %v1638_v61 = vpack.c.bf16 %v1837_v59, %v1836_v60 }
 0x37d   : > { %1639 = vmatprep.subr.bf16.mxu1 %v1638_v61  ;;  %659 = vperm.xlu0 %1806, %v1315_v0  }
 0x37e   : > { %1641 = vmatpush3.bf16.msra.mxu1 %v1638_v61  ;;  %683 = vperm.xlu1 %1807, %v1318_v5  }
 0x381   : > { %688 = vperm.xlu0 %1806, %v1319_v6  }
 0x382   : > { %664 = vperm.xlu1 %1807, %v1316_v7  }
 0x385   : > { %669 = vperm.xlu0 %1806, %v1317_v8  }
 0x386   : > { %693 = vperm.xlu1 %1807, %v1320_v9  }
 0x389   : > { %698 = vperm.xlu0 %1806, %v1321_v10  }
 0x3df   : > { %v1840_v11 = vpop.permute.xlu1 %1839 }
 0x3e0   : > { %v1842_v12 = vunpack.i.h.bf16 %v1840_v11  ;;  %v1841_v13 = vunpack.i.l.bf16 %v1840_v11 }
 0x3e2   : > { %v1642_v14 = vpack.c.bf16 %v1842_v12, %v1841_v13 }
 0x3e3   : > { %v1845_v15 = vpop.permute.xlu0 %1844  ;;  %v1850_v16 = vpop.permute.xlu1 %1849 }
 0x3e4   : > { %v1847_v17 = vunpack.i.h.bf16 %v1845_v15  ;;  %v1846_v18 = vunpack.i.l.bf16 %v1845_v15  ;;  %v1852_v19 = vunpack.i.h.bf16 %v1850_v16  ;;  %v1851_v20 = vunpack.i.l.bf16 %v1850_v16  ;;  %1643 = vmatprep.subr.bf16.mxu1 %v1642_v14 }
 0x3e5   : > { %1645 = vmatpush3.bf16.msra.mxu1 %v1642_v14 }
 0x3e6   : > { %v1646_v21 = vpack.c.bf16 %v1847_v17, %v1846_v18  ;;  %v1650_v23 = vpack.c.bf16 %v1852_v19, %v1851_v20 }
 0x3e7   : > { %v1855_v22 = vpop.permute.xlu0 %1854  ;;  %v1860_v26 = vpop.permute.xlu1 %1859 }
 0x3e8   : > { %v1857_v24 = vunpack.i.h.bf16 %v1855_v22  ;;  %v1856_v25 = vunpack.i.l.bf16 %v1855_v22  ;;  %1647 = vmatprep.subr.bf16.mxu1 %v1646_v21  ;;  %v1862_v28 = vunpack.i.h.bf16 %v1860_v26  ;;  %v1861_v29 = vunpack.i.l.bf16 %v1860_v26 }
 0x3e9   : > { %1649 = vmatpush3.bf16.msra.mxu1 %v1646_v21 }
 0x3ea   : > { %1651 = vmatprep.subr.bf16.mxu1 %v1650_v23  ;;  %v1654_v27 = vpack.c.bf16 %v1857_v24, %v1856_v25  ;;  %v1658_v31 = vpack.c.bf16 %v1862_v28, %v1861_v29 }
 0x3eb   : > { %v1865_v30 = vpop.permute.xlu0 %1864 }
 0x3ec   : > { %v1867_v32 = vunpack.i.h.bf16 %v1865_v30  ;;  %v1866_v33 = vunpack.i.l.bf16 %v1865_v30 }
 0x3ed   : > { %1653 = vmatpush3.bf16.msra.mxu1 %v1650_v23 }
 0x3ee   : > { %1655 = vmatprep.subr.bf16.mxu1 %v1654_v27  ;;  %v1662_v34 = vpack.c.bf16 %v1867_v32, %v1866_v33 }
 0x3f1   : > { %1657 = vmatpush3.bf16.msra.mxu1 %v1654_v27 }
 0x3f2   : > { %1659 = vmatprep.subr.bf16.mxu1 %v1658_v31 }
 0x3f5   : > { %1661 = vmatpush3.bf16.msra.mxu1 %v1658_v31 }
 0x3f6   : > { %1663 = vmatprep.subr.bf16.mxu1 %v1662_v34 }
 0x3f9   : > { %1665 = vmatpush3.bf16.msra.mxu1 %v1662_v34  ;;  %v655_v39 = vpop.permute.xlu1 %654 }
 0x3fc   : > { %1521 = vmatmul.mubr.f32.vlgmr.msra.gmra.mrb[0].mxu1 %v1311_v35  ;;  %v660_v38 = vpop.permute.xlu0 %659 }
 0x3fd   : > { %1523 = vmatprep.mubr.f32.mxu1 %v1312_v36  ;;  %v684_v41 = vpop.permute.xlu1 %683 }
 0x400   : > { %1524 = vmatmul.mubr.f32.gmra.mrb[2].mxu1 %v1313_v37  ;;  %v689_v40 = vpop.permute.xlu0 %688 }
 0x401   : > { %v665_v44 = vpop.permute.xlu1 %664 }
 0x404   : > { %v670_v42 = vpop.permute.xlu0 %669 }
 0x405   : > { %v694_v57 = vpop.permute.xlu1 %693 }
 0x408   : > { %v699_v54 = vpop.permute.xlu0 %698 }
 0x4cf   : > { %v1522_v43 = vpop.f32.mrb[0].mxu1 }
 0x4d0   : > { %v673_v45 = vmul.f32 %v1522_v43, %v660_v38  ;;  %v628_v46 = vpop.f32.mrb[1].mxu1  ;;  %v1330_v43 = vld [vmem:[%s2290_s1 + $0x40] sm:$0xff] }
 0x4d1   : > { %v672_v47 = vmul.f32 %v655_v39, %v628_v46  ;;  %1558 = vmatprep.mubr.f32.mxu0 %v1330_v43  ;;  %v1336_v46 = vld [vmem:[%s2291_s2 + $0x50] sm:$0xff] }
 0x4d2   : > { %v702_v48 = vadd.f32 %v689_v40, %v673_v45  ;;  %v1335_v45 = vld [vmem:[%s2291_s2 + $0x48] sm:$0xff] }
 0x4d3   : > { %v701_v49 = vadd.f32 %v684_v41, %v672_v47  ;;  %v1525_v50 = vpop.f32.mrb[2].mxu1  ;;  %v1339_v47 = vld [vmem:[%s2292_s3 + $0x48] sm:$0xff] }
 0x4d4   : > { %v711_v51 = vmul.f32 1.442695, %v702_v48  ;;  %v675_v52 = vmul.f32 %v1525_v50, %v670_v42  ;;  %v638_v53 = vpop.f32.mrb[3].mxu1  ;;  %vm706_vm6 = vcmp.gt.f32.partialorder %v702_v48, 0.0  ;;  %v1334_v42 = vld [vmem:[%s2291_s2 + $0x40] sm:$0xff]  ;;  %v1341_v50 = vld [vmem:[%s2292_s3 + $0x58] sm:$0xff] }
 0x4d5   : > { %v709_v55 = vmul.f32 1.442695, %v701_v49  ;;  %v674_v56 = vmul.f32 %v665_v44, %v638_v53  ;;  %vm705_vm7 = vcmp.gt.f32.partialorder %v701_v49, 0.0  ;;  %v1338_v44 = vld [vmem:[%s2292_s3 + $0x40] sm:$0xff] }
 0x4d6   : > { %1936 = vpow2.f32 %v711_v51  ;;  %v704_v58 = vadd.f32 %v699_v54, %v675_v52 }
 0x4d7   : > { %1938 = vpow2.f32 %v709_v55  ;;  %v703_v59 = vadd.f32 %v694_v57, %v674_v56 }
 0x4d8   : > { %v715_v60 = vmul.f32 1.442695, %v704_v58  ;;  %vm708_vm8 = vcmp.gt.f32.partialorder %v704_v58, 0.0 }
 0x4d9   : > { %v713_v61 = vmul.f32 1.442695, %v703_v59  ;;  %vm707_vm9 = vcmp.gt.f32.partialorder %v703_v59, 0.0 }
 0x4da   : > { %1940 = vpow2.f32 %v715_v60 }
 0x4db   : > { %1942 = vpow2.f32 %v713_v61 }
 0x4e0   : > { %v1937_v62 = vpop.eup %1936 }
 0x4e1   : > { %v1939_v63 = vpop.eup %1938  ;;  %v1323_v0 = vadd.f32 -1.0, %v1937_v62 }
 0x4e2   : > { %v1322_v5 = vadd.f32 -1.0, %v1939_v63 }
 0x4e3   : > { %v722_v6 = vsel %vm706_vm6, %v702_v48, %v1323_v0  ;;  %v1340_v48 = vld [vmem:[%s2292_s3 + $0x50] sm:$0xff]  ;;  %vm1237_vm6 = vcmask 130048  }
 0x4e4   : > { %v1941_v7 = vpop.eup %1940  ;;  %v721_v8 = vsel %vm705_vm7, %v701_v49, %v1322_v5  ;;  %v726_v9 = vadd.f32 %v722_v6, %v2043_v4  ;;  %v1337_v49 = vld [vmem:[%s2291_s2 + $0x58] sm:$0xff] }
 0x4e5   : > { %v1943_v10 = vpop.eup %1942  ;;  %v1325_v11 = vadd.f32 -1.0, %v1941_v7  ;;  %v725_v12 = vadd.f32 %v721_v8, %v2035_v2 }
 0x4e6   : > { %v1324_v13 = vadd.f32 -1.0, %v1943_v10  ;;  %v735_v14 = vmul.f32 1.442695, %v726_v9  ;;  %vm730_vm10 = vcmp.gt.f32.partialorder %v726_v9, 0.0 }
 0x4e7   : > { %v724_v15 = vsel %vm708_vm8, %v704_v58, %v1325_v11  ;;  %v733_v16 = vmul.f32 1.442695, %v725_v12  ;;  %vm729_vm11 = vcmp.gt.f32.partialorder %v725_v12, 0.0 }
 0x4e8   : > { %v723_v17 = vsel %vm707_vm9, %v703_v59, %v1324_v13  ;;  %1944 = vpow2.f32 %v735_v14  ;;  %v728_v18 = vadd.f32 %v724_v15, %v2041_v3  ;;  %v1331_v15 = vld [vmem:[%s2290_s1 + $0x48] sm:$0xff] }
 0x4e9   : > { %1946 = vpow2.f32 %v733_v16  ;;  %v727_v19 = vadd.f32 %v723_v17, %v2033_v1  ;;  %v1332_v16 = vld [vmem:[%s2290_s1 + $0x50] sm:$0xff]  ;;  %v1333_v17 = vld [vmem:[%s2290_s1 + $0x58] sm:$0xff] }
 0x4ea   : > { %v739_v20 = vmul.f32 1.442695, %v728_v18  ;;  %vm732_vm12 = vcmp.gt.f32.partialorder %v728_v18, 0.0 }
 0x4eb   : > { %v737_v21 = vmul.f32 1.442695, %v727_v19  ;;  %vm731_vm13 = vcmp.gt.f32.partialorder %v727_v19, 0.0 }
 0x4ec   : > { %1948 = vpow2.f32 %v739_v20 }
 0x4ed   : > { %1950 = vpow2.f32 %v737_v21 }
 0x4f2   : > { %v1945_v4 = vpop.eup %1944 }
 0x4f3   : > { %v1947_v22 = vpop.eup %1946  ;;  %v1327_v2 = vadd.f32 -1.0, %v1945_v4 }
 0x4f4   : > { %v1326_v23 = vadd.f32 -1.0, %v1947_v22 }
 0x4f5   : > { %v2161_v24 = vsel %vm730_vm10, %v726_v9, %v1327_v2 }
 0x4f6   : > { %v1949_v25 = vpop.eup %1948  ;;  %755 = vrot.lane.b32.xlu0 %v2161_v24, %s1985_s21  ;;  %v2165_v3 = vsel %vm729_vm11, %v725_v12, %v1326_v23 }
 0x4f7   : > { %v1951_v26 = vpop.eup %1950  ;;  %753 = vrot.lane.b32.xlu1 %v2165_v3, %s1985_s21  ;;  %v1329_v1 = vadd.f32 -1.0, %v1949_v25 }
 0x4f8   : > { %v1328_v27 = vadd.f32 -1.0, %v1951_v26 }
 0x4f9   : > { %v2169_v28 = vsel %vm732_vm12, %v728_v18, %v1329_v1 }
 0x4fa   : > { %759 = vrot.lane.b32.xlu0 %v2169_v28, %s1985_s21  ;;  %v2173_v29 = vsel %vm731_vm13, %v727_v19, %v1328_v27 }
 0x4fb   : > { %757 = vrot.lane.b32.xlu1 %v2173_v29, %s1985_s21 }
 0x568   : > { %v756_v30 = vpop.permute.xlu0 %755 }
 0x569   : > { %766 = vst.msk [vmem:[#allocation2 + $0x8] sm:$0xff] %vm223_vm1, %v756_v30  ;;  %v754_v31 = vpop.permute.xlu1 %753 }
 0x56a   : > { %765 = vst.msk [vmem:[#allocation2] sm:$0xff] %vm223_vm1, %v754_v31 }
 0x56c   : > { %v760_v32 = vpop.permute.xlu0 %759 }
 0x56d   : > { %768 = vst.msk [vmem:[#allocation2 + $0x18] sm:$0xff] %vm223_vm1, %v760_v32  ;;  %v758_v33 = vpop.permute.xlu1 %757 }
 0x56e   : > { %767 = vst.msk [vmem:[#allocation2 + $0x10] sm:$0xff] %vm223_vm1, %v758_v33 }
 0x570   : > { %v770_v34 = vld [vmem:[#allocation2 + $0x8] sm:$0xff] }
 0x571   : > { %v769_v35 = vld [vmem:[#allocation2] sm:$0xff] }
 0x572   : > { %v1666_v36 = vpack.c.bf16 %v770_v34, %v769_v35  ;;  %v1868_v37 = vpack.i.bf16 %v770_v34, %v769_v35 }
 0x574   : > { %1667 = vmatprep.subr.bf16.mxu0 %v1666_v36  ;;  %1869 = vrot.lane.b32.xlu1 %v1868_v37, %s1987_s23  ;;  %v772_v38 = vld [vmem:[#allocation2 + $0x18] sm:$0xff] }
 0x575   : > { %1669 = vmatpush3.bf16.msra.mxu0 %v1666_v36  ;;  %v771_v39 = vld [vmem:[#allocation2 + $0x10] sm:$0xff] }
 0x576   : > { %v1873_v40 = vpack.i.bf16 %v772_v38, %v771_v39  ;;  %v1670_v41 = vpack.c.bf16 %v772_v38, %v771_v39 }
 0x578   : > { %1879 = vrot.lane.b32.xlu1 %v1868_v37, %s1990_s6  ;;  %1874 = vrot.lane.b32.xlu0 %v1873_v40, %s1987_s23 }
 0x579   : > { %1671 = vmatprep.subr.bf16.mxu0 %v1670_v41 }
 0x57a   : > { %1673 = vmatpush3.bf16.msra.mxu0 %v1670_v41 }
 0x57c   : > { %1889 = vrot.lane.b32.xlu1 %v1868_v37, %s1991_s7  ;;  %1884 = vrot.lane.b32.xlu0 %v1873_v40, %s1990_s6 }
 0x580   : > { %910 = vperm.xlu1 %1807, %v1334_v42   ;;  %1894 = vrot.lane.b32.xlu0 %v1873_v40, %s1991_s7 }
 0x584   : > { %939 = vperm.xlu1 %1807, %v1338_v44   ;;  %915 = vperm.xlu0 %1806, %v1335_v45  }
 0x588   : > { %920 = vperm.xlu1 %1807, %v1336_v46   ;;  %944 = vperm.xlu0 %1806, %v1339_v47  }
 0x58c   : > { %949 = vperm.xlu1 %1807, %v1340_v48   ;;  %925 = vperm.xlu0 %1806, %v1337_v49  }
 0x590   : > { %954 = vperm.xlu0 %1806, %v1341_v50  }
 0x5e6   : > { %v1870_v51 = vpop.permute.xlu1 %1869 }
 0x5e7   : > { %v1872_v52 = vunpack.i.h.bf16 %v1870_v51  ;;  %v1871_v53 = vunpack.i.l.bf16 %v1870_v51 }
 0x5e9   : > { %v1674_v54 = vpack.c.bf16 %v1872_v52, %v1871_v53 }
 0x5ea   : > { %v1875_v55 = vpop.permute.xlu0 %1874  ;;  %v1880_v56 = vpop.permute.xlu1 %1879 }
 0x5eb   : > { %v1877_v57 = vunpack.i.h.bf16 %v1875_v55  ;;  %v1876_v58 = vunpack.i.l.bf16 %v1875_v55  ;;  %v1882_v59 = vunpack.i.h.bf16 %v1880_v56  ;;  %v1881_v60 = vunpack.i.l.bf16 %v1880_v56  ;;  %1675 = vmatprep.subr.bf16.mxu0 %v1674_v54 }
 0x5ec   : > { %1677 = vmatpush3.bf16.msra.mxu0 %v1674_v54 }
 0x5ed   : > { %v1678_v61 = vpack.c.bf16 %v1877_v57, %v1876_v58  ;;  %v1682_v63 = vpack.c.bf16 %v1882_v59, %v1881_v60 }
 0x5ee   : > { %v1885_v62 = vpop.permute.xlu0 %1884  ;;  %v1890_v6 = vpop.permute.xlu1 %1889 }
 0x5ef   : > { %v1887_v0 = vunpack.i.h.bf16 %v1885_v62  ;;  %v1886_v5 = vunpack.i.l.bf16 %v1885_v62  ;;  %1679 = vmatprep.subr.bf16.mxu0 %v1678_v61  ;;  %v1892_v8 = vunpack.i.h.bf16 %v1890_v6  ;;  %v1891_v9 = vunpack.i.l.bf16 %v1890_v6  ;;  %v1350_v6 = vld [vmem:[%s2291_s2 + $0x60] sm:$0xff] }
 0x5f0   : > { %1681 = vmatpush3.bf16.msra.mxu0 %v1678_v61 }
 0x5f1   : > { %1683 = vmatprep.subr.bf16.mxu0 %v1682_v63  ;;  %v1686_v7 = vpack.c.bf16 %v1887_v0, %v1886_v5  ;;  %v1690_v11 = vpack.c.bf16 %v1892_v8, %v1891_v9  ;;  %v1352_v8 = vld [vmem:[%s2291_s2 + $0x70] sm:$0xff]  ;;  %v1351_v9 = vld [vmem:[%s2291_s2 + $0x68] sm:$0xff] }
 0x5f2   : > { %v1895_v10 = vpop.permute.xlu0 %1894 }
 0x5f3   : > { %v1897_v12 = vunpack.i.h.bf16 %v1895_v10  ;;  %v1896_v13 = vunpack.i.l.bf16 %v1895_v10  ;;  %v1354_v10 = vld [vmem:[%s2292_s3 + $0x60] sm:$0xff] }
 0x5f4   : > { %1685 = vmatpush3.bf16.msra.mxu0 %v1682_v63 }
 0x5f5   : > { %1687 = vmatprep.subr.bf16.mxu0 %v1686_v7  ;;  %v1694_v14 = vpack.c.bf16 %v1897_v12, %v1896_v13  ;;  %v1356_v12 = vld [vmem:[%s2292_s3 + $0x70] sm:$0xff]  ;;  %v1355_v13 = vld [vmem:[%s2292_s3 + $0x68] sm:$0xff] }
 0x5f8   : > { %1689 = vmatpush3.bf16.msra.mxu0 %v1686_v7  ;;  %v1346_v7 = vld [vmem:[%s2290_s1 + $0x60] sm:$0xff] }
 0x5f9   : > { %1691 = vmatprep.subr.bf16.mxu0 %v1690_v11  ;;  %1596 = vmatprep.mubr.f32.mxu1 %v1346_v7 }
 0x5fc   : > { %1693 = vmatpush3.bf16.msra.mxu0 %v1690_v11  ;;  %v1353_v11 = vld [vmem:[%s2291_s2 + $0x78] sm:$0xff] }
 0x5fd   : > { %1695 = vmatprep.subr.bf16.mxu0 %v1694_v14 }
 0x5ff   : > { %v911_v19 = vpop.permute.xlu1 %910 }
 0x600   : > { %1697 = vmatpush3.bf16.msra.mxu0 %v1694_v14  ;;  %v1357_v14 = vld [vmem:[%s2292_s3 + $0x78] sm:$0xff] }
 0x603   : > { %1559 = vmatmul.mubr.f32.vlgmr.msra.gmra.mrb[4].mxu0 %v1331_v15  ;;  %v916_v18 = vpop.permute.xlu0 %915  ;;  %v940_v21 = vpop.permute.xlu1 %939 }
 0x604   : > { %1561 = vmatprep.mubr.f32.mxu0 %v1332_v16 }
 0x607   : > { %1562 = vmatmul.mubr.f32.gmra.mrb[6].mxu0 %v1333_v17  ;;  %v945_v20 = vpop.permute.xlu0 %944  ;;  %v921_v2 = vpop.permute.xlu1 %920 }
 0x60b   : > { %v926_v4 = vpop.permute.xlu0 %925  ;;  %v950_v37 = vpop.permute.xlu1 %949 }
 0x60f   : > { %v955_v34 = vpop.permute.xlu0 %954 }
 0x6d6   : > { %v1560_v22 = vpop.f32.mrb[4].mxu0 }
 0x6d7   : > { %v929_v23 = vmul.f32 %v1560_v22, %v916_v18  ;;  %v884_v25 = vpop.f32.mrb[5].mxu0 }
 0x6d8   : > { %v928_v26 = vmul.f32 %v911_v19, %v884_v25 }
 0x6d9   : > { %v958_v1 = vadd.f32 %v945_v20, %v929_v23 }
 0x6da   : > { %v957_v27 = vadd.f32 %v940_v21, %v928_v26  ;;  %v1563_v30 = vpop.f32.mrb[6].mxu0 }
 0x6db   : > { %v967_v31 = vmul.f32 1.442695, %v958_v1  ;;  %v931_v32 = vmul.f32 %v1563_v30, %v926_v4  ;;  %v894_v33 = vpop.f32.mrb[7].mxu0  ;;  %vm962_vm14 = vcmp.gt.f32.partialorder %v958_v1, 0.0 }
 0x6dc   : > { %v965_v35 = vmul.f32 1.442695, %v957_v27  ;;  %v930_v36 = vmul.f32 %v921_v2, %v894_v33  ;;  %vm961_vm15 = vcmp.gt.f32.partialorder %v957_v27, 0.0 }
 0x6dd   : > { %1952 = vpow2.f32 %v967_v31  ;;  %v960_v38 = vadd.f32 %v955_v34, %v931_v32 }
 0x6de   : > { %1954 = vpow2.f32 %v965_v35  ;;  %v959_v39 = vadd.f32 %v950_v37, %v930_v36 }
 0x6df   : > { %v971_v40 = vmul.f32 1.442695, %v960_v38  ;;  %vm964_vm0 = vcmp.gt.f32.partialorder %v960_v38, 0.0 }
 0x6e0   : > { %v969_v41 = vmul.f32 1.442695, %v959_v39  ;;  %vm963_vm2 = vcmp.gt.f32.partialorder %v959_v39, 0.0 }
 0x6e1   : > { %1956 = vpow2.f32 %v971_v40  ;;  %v1348_v40 = vld [vmem:[%s2290_s1 + $0x70] sm:$0xff] }
 0x6e2   : > { %1958 = vpow2.f32 %v969_v41  ;;  %v1349_v41 = vld [vmem:[%s2290_s1 + $0x78] sm:$0xff] }
 0x6e7   : > { %v1953_v42 = vpop.eup %1952 }
 0x6e8   : > { %v1955_v43 = vpop.eup %1954  ;;  %v1343_v44 = vadd.f32 -1.0, %v1953_v42 }
 0x6e9   : > { %v1342_v45 = vadd.f32 -1.0, %v1955_v43 }
 0x6ea   : > { %v978_v46 = vsel %vm962_vm14, %v958_v1, %v1343_v44 }
 0x6eb   : > { %v1957_v47 = vpop.eup %1956  ;;  %987 = vrot.lane.b32.xlu0 %v978_v46, %s1985_s21  ;;  %v977_v48 = vsel %vm961_vm15, %v957_v27, %v1342_v45 }
 0x6ec   : > { %v1959_v49 = vpop.eup %1958  ;;  %985 = vrot.lane.b32.xlu1 %v977_v48, %s1985_s21  ;;  %v1345_v50 = vadd.f32 -1.0, %v1957_v47 }
 0x6ed   : > { %v1344_v51 = vadd.f32 -1.0, %v1959_v49 }
 0x6ee   : > { %v980_v52 = vsel %vm964_vm0, %v960_v38, %v1345_v50 }
 0x6ef   : > { %991 = vrot.lane.b32.xlu0 %v980_v52, %s1985_s21  ;;  %v979_v53 = vsel %vm963_vm2, %v959_v39, %v1344_v51  ;;  %v1347_v39 = vld [vmem:[%s2290_s1 + $0x68] sm:$0xff] }
 0x6f0   : > { %989 = vrot.lane.b32.xlu1 %v979_v53, %s1985_s21 }
 0x75d   : > { %v988_v54 = vpop.permute.xlu0 %987 }
 0x75e   : > { %998 = vst.msk [vmem:[#allocation2 + $0x8] sm:$0xff] %vm223_vm1, %v988_v54  ;;  %v986_v55 = vpop.permute.xlu1 %985 }
 0x75f   : > { %997 = vst.msk [vmem:[#allocation2] sm:$0xff] %vm223_vm1, %v986_v55 }
 0x761   : > { %v992_v56 = vpop.permute.xlu0 %991 }
 0x762   : > { %1000 = vst.msk [vmem:[#allocation2 + $0x18] sm:$0xff] %vm223_vm1, %v992_v56  ;;  %v990_v57 = vpop.permute.xlu1 %989 }
 0x763   : > { %999 = vst.msk [vmem:[#allocation2 + $0x10] sm:$0xff] %vm223_vm1, %v990_v57 }
 0x765   : > { %v1002_v58 = vld [vmem:[#allocation2 + $0x8] sm:$0xff] }
 0x766   : > { %v1001_v59 = vld [vmem:[#allocation2] sm:$0xff] }
 0x767   : > { %v1698_v60 = vpack.c.bf16 %v1002_v58, %v1001_v59  ;;  %v1898_v61 = vpack.i.bf16 %v1002_v58, %v1001_v59 }
 0x769   : > { %1699 = vmatprep.subr.bf16.mxu1 %v1698_v60  ;;  %1899 = vrot.lane.b32.xlu1 %v1898_v61, %s1987_s23  ;;  %v1004_v62 = vld [vmem:[#allocation2 + $0x18] sm:$0xff] }
 0x76a   : > { %1701 = vmatpush3.bf16.msra.mxu1 %v1698_v60  ;;  %v1003_v63 = vld [vmem:[#allocation2 + $0x10] sm:$0xff] }
 0x76b   : > { %v1903_v0 = vpack.i.bf16 %v1004_v62, %v1003_v63  ;;  %v1702_v5 = vpack.c.bf16 %v1004_v62, %v1003_v63 }
 0x76d   : > { %1909 = vrot.lane.b32.xlu1 %v1898_v61, %s1990_s6  ;;  %1904 = vrot.lane.b32.xlu0 %v1903_v0, %s1987_s23 }
 0x76e   : > { %1703 = vmatprep.subr.bf16.mxu1 %v1702_v5 }
 0x76f   : > { %1705 = vmatpush3.bf16.msra.mxu1 %v1702_v5 }
 0x771   : > { %1919 = vrot.lane.b32.xlu1 %v1898_v61, %s1991_s7  ;;  %1914 = vrot.lane.b32.xlu0 %v1903_v0, %s1990_s6 }
 0x775   : > { %1142 = vperm.xlu1 %1807, %v1350_v6   ;;  %1924 = vrot.lane.b32.xlu0 %v1903_v0, %s1991_s7 }
 0x779   : > { %1152 = vperm.xlu1 %1807, %v1352_v8   ;;  %1147 = vperm.xlu0 %1806, %v1351_v9  }
 0x77d   : > { %1171 = vperm.xlu1 %1807, %v1354_v10   ;;  %1157 = vperm.xlu0 %1806, %v1353_v11  }
 0x781   : > { %1181 = vperm.xlu1 %1807, %v1356_v12   ;;  %1176 = vperm.xlu0 %1806, %v1355_v13  }
 0x785   : > { %1186 = vperm.xlu0 %1806, %v1357_v14  }
 0x7db   : > { %v1900_v15 = vpop.permute.xlu1 %1899 }
 0x7dc   : > { %v1902_v16 = vunpack.i.h.bf16 %v1900_v15  ;;  %v1901_v17 = vunpack.i.l.bf16 %v1900_v15 }
 0x7de   : > { %v1706_v18 = vpack.c.bf16 %v1902_v16, %v1901_v17 }
 0x7df   : > { %v1905_v19 = vpop.permute.xlu0 %1904  ;;  %v1910_v20 = vpop.permute.xlu1 %1909 }
 0x7e0   : > { %v1907_v21 = vunpack.i.h.bf16 %v1905_v19  ;;  %v1906_v4 = vunpack.i.l.bf16 %v1905_v19  ;;  %v1912_v22 = vunpack.i.h.bf16 %v1910_v20  ;;  %v1911_v2 = vunpack.i.l.bf16 %v1910_v20  ;;  %1707 = vmatprep.subr.bf16.mxu1 %v1706_v18 }
 0x7e1   : > { %1709 = vmatpush3.bf16.msra.mxu1 %v1706_v18 }
 0x7e2   : > { %v1710_v23 = vpack.c.bf16 %v1907_v21, %v1906_v4  ;;  %v1714_v26 = vpack.c.bf16 %v1912_v22, %v1911_v2 }
 0x7e3   : > { %v1915_v25 = vpop.permute.xlu0 %1914  ;;  %v1920_v30 = vpop.permute.xlu1 %1919 }
 0x7e4   : > { %v1917_v1 = vunpack.i.h.bf16 %v1915_v25  ;;  %v1916_v27 = vunpack.i.l.bf16 %v1915_v25  ;;  %1711 = vmatprep.subr.bf16.mxu1 %v1710_v23  ;;  %v1922_v32 = vunpack.i.h.bf16 %v1920_v30  ;;  %v1921_v33 = vunpack.i.l.bf16 %v1920_v30 }
 0x7e5   : > { %1713 = vmatpush3.bf16.msra.mxu1 %v1710_v23 }
 0x7e6   : > { %1715 = vmatprep.subr.bf16.mxu1 %v1714_v26  ;;  %v1718_v31 = vpack.c.bf16 %v1917_v1, %v1916_v27  ;;  %v1722_v35 = vpack.c.bf16 %v1922_v32, %v1921_v33 }
 0x7e7   : > { %v1925_v34 = vpop.permute.xlu0 %1924 }
 0x7e8   : > { %v1927_v36 = vunpack.i.h.bf16 %v1925_v34  ;;  %v1926_v37 = vunpack.i.l.bf16 %v1925_v34 }
 0x7e9   : > { %1717 = vmatpush3.bf16.msra.mxu1 %v1714_v26 }
 0x7ea   : > { %1719 = vmatprep.subr.bf16.mxu1 %v1718_v31  ;;  %v1726_v38 = vpack.c.bf16 %v1927_v36, %v1926_v37 }
 0x7ed   : > { %1721 = vmatpush3.bf16.msra.mxu1 %v1718_v31 }
 0x7ee   : > { %1723 = vmatprep.subr.bf16.mxu1 %v1722_v35 }
 0x7f1   : > { %1725 = vmatpush3.bf16.msra.mxu1 %v1722_v35 }
 0x7f2   : > { %1727 = vmatprep.subr.bf16.mxu1 %v1726_v38 }
 0x7f4   : > { %v1143_v43 = vpop.permute.xlu1 %1142 }
 0x7f5   : > { %1729 = vmatpush3.bf16.msra.mxu1 %v1726_v38 }
 0x7f8   : > { %1597 = vmatmul.mubr.f32.vlgmr.msra.gmra.mrb[4].mxu1 %v1347_v39  ;;  %v1148_v42 = vpop.permute.xlu0 %1147  ;;  %v1153_v45 = vpop.permute.xlu1 %1152 }
 0x7f9   : > { %1599 = vmatprep.mubr.f32.mxu1 %v1348_v40 }
 0x7fc   : > { %1600 = vmatmul.mubr.f32.gmra.mrb[6].mxu1 %v1349_v41  ;;  %v1158_v44 = vpop.permute.xlu0 %1157  ;;  %v1172_v48 = vpop.permute.xlu1 %1171 }
 0x800   : > { %v1177_v46 = vpop.permute.xlu0 %1176  ;;  %v1182_v61 = vpop.permute.xlu1 %1181 }
 0x804   : > { %v1187_v58 = vpop.permute.xlu0 %1186 }
 0x8cb   : > { %v1598_v47 = vpop.f32.mrb[4].mxu1 }
 0x8cc   : > { %v1161_v49 = vmul.f32 %v1598_v47, %v1148_v42  ;;  %v1116_v50 = vpop.f32.mrb[5].mxu1 }
 0x8cd   : > { %v1160_v51 = vmul.f32 %v1143_v43, %v1116_v50 }
 0x8ce   : > { %v1190_v52 = vadd.f32 %v1177_v46, %v1161_v49 }
 0x8cf   : > { %v1189_v53 = vadd.f32 %v1172_v48, %v1160_v51  ;;  %v1601_v54 = vpop.f32.mrb[6].mxu1 }
 0x8d0   : > { %v1199_v55 = vmul.f32 1.442695, %v1190_v52  ;;  %v1163_v56 = vmul.f32 %v1601_v54, %v1158_v44  ;;  %v1126_v57 = vpop.f32.mrb[7].mxu1  ;;  %vm1194_vm1 = vcmp.gt.f32.partialorder %v1190_v52, 0.0 }
 0x8d1   : > { %v1197_v59 = vmul.f32 1.442695, %v1189_v53  ;;  %v1162_v60 = vmul.f32 %v1153_v45, %v1126_v57  ;;  %vm1193_vm3 = vcmp.gt.f32.partialorder %v1189_v53, 0.0 }
 0x8d2   : > { %1960 = vpow2.f32 %v1199_v55  ;;  %v1192_v62 = vadd.f32 %v1187_v58, %v1163_v56 }
 0x8d3   : > { %1962 = vpow2.f32 %v1197_v59  ;;  %v1191_v63 = vadd.f32 %v1182_v61, %v1162_v60 }
 0x8d4   : > { %v1203_v0 = vmul.f32 1.442695, %v1192_v62  ;;  %vm1196_vm4 = vcmp.gt.f32.partialorder %v1192_v62, 0.0 }
 0x8d5   : > { %v1201_v5 = vmul.f32 1.442695, %v1191_v63  ;;  %vm1195_vm5 = vcmp.gt.f32.partialorder %v1191_v63, 0.0 }
 0x8d6   : > { %1964 = vpow2.f32 %v1203_v0 }
 0x8d7   : > { %1966 = vpow2.f32 %v1201_v5 }
 0x8dc   : > { %v1961_v6 = vpop.eup %1960 }
 0x8dd   : > { %v1963_v7 = vpop.eup %1962  ;;  %v1359_v8 = vadd.f32 -1.0, %v1961_v6 }
 0x8de   : > { %v1358_v9 = vadd.f32 -1.0, %v1963_v7 }
 0x8df   : > { %v1210_v10 = vsel %vm1194_vm1, %v1190_v52, %v1359_v8 }
 0x8e0   : > { %v1965_v11 = vpop.eup %1964  ;;  %v1214_v12 = vadd.f32 %v1210_v10, %v2161_v24  ;;  %v1209_v13 = vsel %vm1193_vm3, %v1189_v53, %v1358_v9 }
 0x8e1   : > { %v1967_v14 = vpop.eup %1966  ;;  %v1213_v15 = vadd.f32 %v1209_v13, %v2165_v3  ;;  %v1361_v16 = vadd.f32 -1.0, %v1965_v11 }
 0x8e2   : > { %v1223_v17 = vmul.f32 1.442695, %v1214_v12  ;;  %v1360_v18 = vadd.f32 -1.0, %v1967_v14  ;;  %vm1218_vm7 = vcmp.gt.f32.partialorder %v1214_v12, 0.0 }
 0x8e3   : > { %v1221_v19 = vmul.f32 1.442695, %v1213_v15  ;;  %v1212_v20 = vsel %vm1196_vm4, %v1192_v62, %v1361_v16  ;;  %vm1217_vm8 = vcmp.gt.f32.partialorder %v1213_v15, 0.0 }
 0x8e4   : > { %1968 = vpow2.f32 %v1223_v17  ;;  %v1216_v21 = vadd.f32 %v1212_v20, %v2169_v28  ;;  %v1211_v4 = vsel %vm1195_vm5, %v1191_v63, %v1360_v18 }
 0x8e5   : > { %1970 = vpow2.f32 %v1221_v19  ;;  %v1215_v22 = vadd.f32 %v1211_v4, %v2173_v29 }
 0x8e6   : > { %v1227_v24 = vmul.f32 1.442695, %v1216_v21  ;;  %vm1220_vm9 = vcmp.gt.f32.partialorder %v1216_v21, 0.0 }
 0x8e7   : > { %v1225_v2 = vmul.f32 1.442695, %v1215_v22  ;;  %vm1219_vm10 = vcmp.gt.f32.partialorder %v1215_v22, 0.0 }
 0x8e8   : > { %1972 = vpow2.f32 %v1227_v24 }
 0x8e9   : > { %1974 = vpow2.f32 %v1225_v2 }
 0x8ee   : > { %v1969_v3 = vpop.eup %1968 }
 0x8ef   : > { %v1971_v23 = vpop.eup %1970  ;;  %v1363_v25 = vadd.f32 -1.0, %v1969_v3 }
 0x8f0   : > { %v1362_v26 = vadd.f32 -1.0, %v1971_v23 }
 0x8f1   : > { %v1234_v28 = vsel %vm1218_vm7, %v1214_v12, %v1363_v25 }
 0x8f2   : > { %v1973_v1 = vpop.eup %1972  ;;  %1239 = vst.msk [vmem:[%s197_s14 + $0x8] sm:$0xff] %vm1237_vm6, %v1234_v28  ;;  %v1233_v29 = vsel %vm1217_vm8, %v1213_v15, %v1362_v26 }
 0x8f3   : > { %v1975_v27 = vpop.eup %1974  ;;  %1238 = vst.msk [vmem:[%s197_s14] sm:$0xff] %vm1237_vm6, %v1233_v29  ;;  %v1365_v30 = vadd.f32 -1.0, %v1973_v1 }
 0x8f4   : > { %v1364_v31 = vadd.f32 -1.0, %v1975_v27 }
 0x8f5   : > { %v1236_v32 = vsel %vm1220_vm9, %v1216_v21, %v1365_v30 }
 0x8f6   : > { %1241 = vst.msk [vmem:[%s197_s14 + $0x18] sm:$0xff] %vm1237_vm6, %v1236_v32  ;;  %v1235_v33 = vsel %vm1219_vm10, %v1215_v22, %v1364_v31 }
 0x8f7   : > { %1240 = vst.msk [vmem:[%s197_s14 + $0x10] sm:$0xff] %vm1237_vm6, %v1235_v33 }
 0x8f8 PF: > { %s14_s15 = sadd.s32 1, %s1982_s15  }
 0x8f9   : > { %p11_p4 = scmp.ge.s32.totalorder %s14_s15, 4  }
 0x8fb   :  { %13 = sbr.rel (!%p11_p4) target bundleno = 1 (0x1), region = 75 }

</bundles_post_ra>
